<compile_context>
chip_gen: v5e
topology: v5e:2x2
jax: 0.10.0
libtpu: 0.0.40
codegen_flags: <defaults>
</compile_context>

<pallas_src>
import jax
import jax.numpy as jnp
import numpy as np
from jax import lax
from jax.experimental import pallas as pl
from jax.experimental.pallas import tpu as pltpu

_LANE = 128
_TILE_BYTES = 4 << 20      # per-input-block byte budget (double-buffered -> ~8 MiB)
_ACC_ROWS = 64             # accumulator rows: (64,128) f32 = 8 vregs, 32 KiB
_SMALL_N = 1 << 20         # below this, plain fused XLA wins on latency


def _num_tensorcores():
    """2 for chips with 2 TensorCores / megacore per JAX device, else 1."""
    try:
        kind = jax.devices()[0].device_kind.lower()
    except Exception:
        return 1
    if '7' in kind or 'v4' in kind or 'v5p' in kind:
        return 2
    return 1


def _elementwise_loss(x, gan_type, target_is_real, is_disc, target_val):
    """Elementwise GAN-loss transform (f32 in, f32 out). Static config."""
    if gan_type == 'vanilla':
        # BCEWithLogitsLoss: max(x,0) - x*t + log1p(exp(-|x|)); single exp.
        e = jnp.exp(-jnp.abs(x))
        return jnp.maximum(x, 0.0) - x * target_val + jnp.log1p(e)
    elif gan_type == 'lsgan':
        d = x - target_val
        return d * d
    elif gan_type == 'wgan':
        return -x if target_is_real else x
    elif gan_type == 'wgan_softplus':
        z = -x if target_is_real else x
        # softplus(z) = max(z,0) + log1p(exp(-|z|)); single exp.
        return jnp.maximum(z, 0.0) + jnp.log1p(jnp.exp(-jnp.abs(z)))
    elif gan_type == 'hinge':
        if is_disc:
            xin = -x if target_is_real else x
            return jnp.maximum(1.0 + xin, 0.0)     # ReLU(1 + x)
        return -x
    raise NotImplementedError(f'GAN type {gan_type} is not implemented.')


def _make_gan_loss_kernel(gan_type, target_is_real, is_disc, target_val,
                          n_valid, tile_rows, acc_rows, blocks_per_core):
    block_elems = tile_rows * _LANE
    folds = tile_rows // acc_rows          # >= 1, static

    def kernel(x_ref, out_ref, acc_ref):
        c = pl.program_id(0)               # core-split axis ("parallel")
        i = pl.program_id(1)               # streaming reduction axis ("arbitrary")

        @pl.when(i == 0)
        def _():
            acc_ref[...] = jnp.zeros_like(acc_ref)

        x = x_ref[...].astype(jnp.float32)
        v = _elementwise_loss(x, gan_type, target_is_real, is_disc, target_val)

        b = c * blocks_per_core + i        # logical (unclamped) block index
        base = b * block_elems             # first logical element in the block

        def _accumulate(val):
            if folds > 1:
                # Fold the block into the small accumulator (VPU adds only;
                # reshape is a pure relabeling of (8,128) tiles).
                acc_ref[...] += val.reshape(folds, acc_rows, _LANE).sum(axis=0)
            else:
                acc_ref[...] += val

        # Fully-valid block: plain elementwise accumulation.
        @pl.when(base + block_elems <= n_valid)
        def _():
            _accumulate(v)

        # Tail / phantom block: build the element-index mask in-kernel and
        # select (not multiply) so garbage NaN/Inf is discarded.
        @pl.when(base + block_elems > n_valid)
        def _():
            r = lax.broadcasted_iota(jnp.int32, (tile_rows, _LANE), 0)
            l = lax.broadcasted_iota(jnp.int32, (tile_rows, _LANE), 1)
            idx = base + r * _LANE + l
            _accumulate(jnp.where(idx < n_valid, v, 0.0))

        # One cross-lane reduce + one lane-dense store per core sweep.
        @pl.when(i == pl.num_programs(1) - 1)
        def _():
            s = jnp.sum(acc_ref[...])
            lane = lax.broadcasted_iota(jnp.int32, (1, _LANE), 1)
            out_ref[...] = jnp.where(lane == 0, s, 0.0)

    return kernel


def gan_loss(x, gan_type, target_is_real, is_disc=False,
             real_label_val=1.0, fake_label_val=0.0, loss_weight=1.0,
             small_n_threshold=_SMALL_N, tile_bytes=_TILE_BYTES,
             max_tile_rows=None):
    """Pallas implementation of basicsr GANLoss.forward.

    Args:
        x: prediction tensor (any shape; NCHW in the PyTorch reference),
           any float dtype (cast to f32 inside the kernel).
        gan_type: 'vanilla' | 'lsgan' | 'wgan' | 'wgan_softplus' | 'hinge'.
        target_is_real, is_disc: Python bools (static, as in PyTorch usage).
        small_n_threshold: below this element count, use plain fused jnp.
        max_tile_rows: test hook to force small streaming blocks.
    Returns:
        scalar float32 loss.
    """
    gan_type = str(gan_type)
    target_is_real = bool(target_is_real)
    is_disc = bool(is_disc)
    n = int(np.prod(x.shape))
    target_val = float(real_label_val if target_is_real else fake_label_val)

    # ---- small-input fallback: fused XLA elementwise + reduce --------------
    if n < small_n_threshold:
        xf = jnp.reshape(x, (-1,)).astype(jnp.float32)
        v = _elementwise_loss(xf, gan_type, target_is_real, is_disc, target_val)
        loss = jnp.sum(v) / n
        return loss if is_disc else loss * loss_weight

    # ---- lane-dense main body + tiny jnp-handled lane tail (no full pad) ---
    flat = jnp.reshape(x, (-1,))           # free reshape, native dtype
    rem = n % _LANE
    tail_sum = None
    if rem:
        tail = lax.slice(flat, (n - rem,), (n,)).astype(jnp.float32)
        tail_sum = jnp.sum(_elementwise_loss(tail, gan_type, target_is_real,
                                             is_disc, target_val))
        flat = lax.slice(flat, (0,), (n - rem,))
    n_main = n - rem
    rows = n_main // _LANE

    if rows == 0:                          # everything was lane tail
        loss = tail_sum / n
        return loss if is_disc else loss * loss_weight

    x2 = flat.reshape(rows, _LANE)

    itemsize = int(jnp.dtype(x.dtype).itemsize)
    if max_tile_rows is None:
        max_tile_rows = max(
            _ACC_ROWS,
            (tile_bytes // (_LANE * itemsize)) // _ACC_ROWS * _ACC_ROWS)
    tile_rows = max_tile_rows if rows >= max_tile_rows else rows

    # Accumulator shape: fold into (64,128) when possible, else (8,128),
    # else the whole (tiny) block.
    if tile_rows % _ACC_ROWS == 0:
        acc_rows = _ACC_ROWS
    elif tile_rows % 8 == 0:
        acc_rows = 8
    else:
        acc_rows = tile_rows

    ncores = _num_tensorcores()
    total_blocks = -(-rows // tile_rows)
    ncores = max(1, min(ncores, total_blocks))
    blocks_per_core = -(-total_blocks // ncores)

    def x_index_map(c, i):
        # The last core may get a phantom step when total_blocks is not a
        # multiple of ncores: clamp so the DMA reads valid memory; the
        # in-kernel index mask zeroes its contribution.
        return (jnp.minimum(c * blocks_per_core + i, total_blocks - 1), 0)

    kernel = _make_gan_loss_kernel(gan_type, target_is_real, is_disc,
                                   target_val, n_main, tile_rows, acc_rows,
                                   blocks_per_core)

    flops_per = {'vanilla': 6, 'lsgan': 3, 'wgan': 1,
                 'wgan_softplus': 5, 'hinge': 3}[gan_type]
    transc_per = 2 if gan_type in ('vanilla', 'wgan_softplus') else 0
    cost = pl.CostEstimate(
        flops=flops_per * n_main,
        transcendentals=transc_per * n_main,
        bytes_accessed=n_main * itemsize + ncores * _LANE * 4)

    # Lane-dense partial-sum output: one 128-lane row per core (sum in lane 0).
    partials = pl.pallas_call(
        kernel,
        out_shape=jax.ShapeDtypeStruct((1, ncores * _LANE), jnp.float32),
        grid=(ncores, blocks_per_core),
        in_specs=[pl.BlockSpec((tile_rows, _LANE), x_index_map)],
        out_specs=pl.BlockSpec((1, _LANE), lambda c, i: (0, c)),
        scratch_shapes=[pltpu.VMEM((acc_rows, _LANE), jnp.float32)],
        compiler_params=pltpu.CompilerParams(
            dimension_semantics=("parallel", "arbitrary"),
            vmem_limit_bytes=32 * 1024 * 1024),
        cost_estimate=cost,
    )(x2)

    total = jnp.sum(partials)
    if tail_sum is not None:
        total = total + tail_sum
    loss = total / n
    if not is_disc:
        loss = loss * loss_weight
    return loss


# ------------------------- pure-JAX reference -------------------------------
def _softplus(z):
    return jnp.maximum(z, 0.0) + jnp.log1p(jnp.exp(-jnp.abs(z)))


def gan_loss_ref(x, gan_type, target_is_real, is_disc=False,
                 real_label_val=1.0, fake_label_val=0.0, loss_weight=1.0):
    x = jnp.asarray(x, jnp.float32)
    t = real_label_val if target_is_real else fake_label_val
    if gan_type == 'vanilla':
        loss = jnp.mean(jnp.maximum(x, 0.0) - x * t + jnp.log1p(jnp.exp(-jnp.abs(x))))
    elif gan_type == 'lsgan':
        loss = jnp.mean((x - t) ** 2)
    elif gan_type == 'wgan':
        loss = -jnp.mean(x) if target_is_real else jnp.mean(x)
    elif gan_type == 'wgan_softplus':
        loss = jnp.mean(_softplus(-x)) if target_is_real else jnp.mean(_softplus(x))
    elif gan_type == 'hinge':
        if is_disc:
            xin = -x if target_is_real else x
            loss = jnp.mean(jnp.maximum(1.0 + xin, 0.0))
        else:
            loss = -jnp.mean(x)
    else:
        raise NotImplementedError
    return loss if is_disc else loss * loss_weight


if __name__ == "__main__":
    key = jax.random.PRNGKey(0)
    loss_weight = 0.5

    configs = [
        ('vanilla', True, False), ('vanilla', False, True),
        ('lsgan', True, False), ('lsgan', False, True),
        ('wgan', True, False), ('wgan', False, True),
        ('wgan_softplus', True, False), ('wgan_softplus', False, True),
        ('hinge', True, True), ('hinge', False, True), ('hinge', True, False),
    ]

    # Primary: NCHW discriminator logit map (n divisible by 128), forced
    # through the Pallas path (small_n_threshold=0).
    x = jax.random.normal(key, (2, 4, 16, 16), dtype=jnp.float32)
    for gan_type, target_is_real, is_disc in configs:
        got = jax.block_until_ready(
            gan_loss(x, gan_type, target_is_real, is_disc,
                     real_label_val=1.0, fake_label_val=0.0,
                     loss_weight=loss_weight, small_n_threshold=0))
        want = gan_loss_ref(x, gan_type, target_is_real, is_disc,
                            real_label_val=1.0, fake_label_val=0.0,
                            loss_weight=loss_weight)
        np.testing.assert_allclose(np.asarray(got), np.asarray(want),
                                   rtol=1e-5, atol=1e-6)

    # Secondary: small shapes exercising multi-block grids, in-kernel tail
    # mask, lane-tail jnp handling, phantom-block clamp, and the folded
    # accumulator (max_tile_rows forces tiny / multi-fold blocks).
    extra_configs = [('vanilla', True, False), ('lsgan', False, True),
                     ('hinge', True, True), ('wgan_softplus', True, False)]
    for shape, mtr in [((2, 4, 16, 20), 8),      # ragged rows + phantom
                       ((3, 3, 7, 5), 8),        # lane tail (<128) + tiny block
                       ((2, 4, 64, 64), 128)]:   # folds=2 accumulator path
        key, sub = jax.random.split(key)
        xs = jax.random.normal(sub, shape, dtype=jnp.float32)
        for gan_type, target_is_real, is_disc in extra_configs:
            got = jax.block_until_ready(
                gan_loss(xs, gan_type, target_is_real, is_disc,
                         real_label_val=1.0, fake_label_val=0.0,
                         loss_weight=loss_weight, small_n_threshold=0,
                         max_tile_rows=mtr))
            want = gan_loss_ref(xs, gan_type, target_is_real, is_disc,
                                real_label_val=1.0, fake_label_val=0.0,
                                loss_weight=loss_weight)
            np.testing.assert_allclose(np.asarray(got), np.asarray(want),
                                       rtol=1e-5, atol=1e-6)

    # Fallback path (default small-n threshold -> plain fused jnp) sanity.
    got = jax.block_until_ready(
        gan_loss(x, 'lsgan', True, False, loss_weight=loss_weight))
    want = gan_loss_ref(x, 'lsgan', True, False, loss_weight=loss_weight)
    np.testing.assert_allclose(np.asarray(got), np.asarray(want),
                               rtol=1e-5, atol=1e-6)

    print("KERNEL_OK")
</pallas_src>

<mosaic_0001>
module attributes {stable_mosaic.version = 11 : i64} {
  func.func @kernel(%arg0: i32, %arg1: i32, %arg2: memref<16x128xf32, #tpu.memory_space<vmem>>, %arg3: memref<1x128xf32, #tpu.memory_space<vmem>>, %arg4: memref<8x128xf32, #tpu.memory_space<vmem>>) attributes {dimension_semantics = [#tpu.dimension_semantics<parallel>, #tpu.dimension_semantics<arbitrary>], iteration_bounds = array<i64: 1, 1>, scalar_prefetch = 0 : i64, scratch_operands = 1 : i64, tpu.core_type = #tpu.core_type<tc>, window_params = [{transform_indices = @transform_0, window_bounds = array<i64: 16, 128>}, {transform_indices = @transform_1, window_bounds = array<i64: 1, 128>}]} {
    %c0_i32 = arith.constant 0 : i32
    %0 = arith.cmpi eq, %arg1, %c0_i32 : i32
    %1 = arith.extui %0 : i1 to i32
    %c0_i32_0 = arith.constant 0 : i32
    %2 = arith.cmpi ne, %1, %c0_i32_0 : i32
    scf.if %2 {
      %cst_12 = arith.constant 0.000000e+00 : f32
      %29 = vector.broadcast %cst_12 : f32 to vector<8x128xf32>
      %c0_13 = arith.constant 0 : index
      %c0_14 = arith.constant 0 : index
      %30 = vector.load %arg4[%c0_13, %c0_14] : memref<8x128xf32, #tpu.memory_space<vmem>>, vector<8x128xf32>
      tpu.vector_store %arg4[%c0_13, %c0_14], %29 {strides = array<i32>} : memref<8x128xf32, #tpu.memory_space<vmem>>, vector<8x128xf32>,
    } else {
    }
    %c0 = arith.constant 0 : index
    %c0_1 = arith.constant 0 : index
    %3 = vector.load %arg2[%c0, %c0_1] : memref<16x128xf32, #tpu.memory_space<vmem>>, vector<16x128xf32>
    %4 = math.absf %3 : vector<16x128xf32>
    %cst = arith.constant 0.000000e+00 : f32
    %5 = vector.broadcast %cst : f32 to vector<16x128xf32>
    %6 = arith.subf %5, %4 : vector<16x128xf32>
    %7 = math.exp %6 : vector<16x128xf32>
    %cst_2 = arith.constant 0.000000e+00 : f32
    %8 = vector.broadcast %cst_2 : f32 to vector<16x128xf32>
    %9 = arith.maximumf %3, %8 : vector<16x128xf32>
    %cst_3 = arith.constant 1.000000e+00 : f32
    %10 = vector.broadcast %cst_3 : f32 to vector<16x128xf32>
    %11 = arith.mulf %3, %10 : vector<16x128xf32>
    %12 = arith.subf %9, %11 : vector<16x128xf32>
    %13 = math.log1p %7 : vector<16x128xf32>
    %14 = arith.addf %12, %13 : vector<16x128xf32>
    %c1_i32 = arith.constant 1 : i32
    %15 = arith.muli %arg0, %c1_i32 : i32
    %16 = arith.addi %15, %arg1 : i32
    %c2048_i32 = arith.constant 2048 : i32
    %17 = arith.muli %16, %c2048_i32 : i32
    %c2048_i32_4 = arith.constant 2048 : i32
    %18 = arith.addi %17, %c2048_i32_4 : i32
    %c2048_i32_5 = arith.constant 2048 : i32
    %19 = arith.cmpi sle, %18, %c2048_i32_5 : i32
    %20 = arith.extui %19 : i1 to i32
    %c0_i32_6 = arith.constant 0 : i32
    %21 = arith.cmpi ne, %20, %c0_i32_6 : i32
    scf.if %21 {
      %c0_12 = arith.constant 0 : index
      %c0_13 = arith.constant 0 : index
      %29 = vector.load %arg4[%c0_12, %c0_13] : memref<8x128xf32, #tpu.memory_space<vmem>>, vector<8x128xf32>
      %30 = vector.shape_cast %14 : vector<16x128xf32> to vector<2x8x128xf32>
      %cst_14 = arith.constant dense<0.000000e+00> : vector<8x128xf32>
      %31 = vector.multi_reduction <add>, %30, %cst_14 [0] : vector<2x8x128xf32> to vector<8x128xf32>
      %32 = arith.addf %29, %31 : vector<8x128xf32>
      %c0_15 = arith.constant 0 : index
      %c0_16 = arith.constant 0 : index
      %33 = vector.load %arg4[%c0_15, %c0_16] : memref<8x128xf32, #tpu.memory_space<vmem>>, vector<8x128xf32>
      tpu.vector_store %arg4[%c0_15, %c0_16], %32 {strides = array<i32>} : memref<8x128xf32, #tpu.memory_space<vmem>>, vector<8x128xf32>,
    } else {
    }
    %c2048_i32_7 = arith.constant 2048 : i32
    %22 = arith.addi %17, %c2048_i32_7 : i32
    %c2048_i32_8 = arith.constant 2048 : i32
    %23 = arith.cmpi sgt, %22, %c2048_i32_8 : i32
    %24 = arith.extui %23 : i1 to i32
    %c0_i32_9 = arith.constant 0 : i32
    %25 = arith.cmpi ne, %24, %c0_i32_9 : i32
    scf.if %25 {
      %29 = tpu.iota {dimensions = array<i32: 0>} : vector<16x128xi32>
      %30 = tpu.iota {dimensions = array<i32: 1>} : vector<16x128xi32>
      %c128_i32 = arith.constant 128 : i32
      %31 = vector.broadcast %c128_i32 : i32 to vector<16x128xi32>
      %32 = arith.muli %29, %31 : vector<16x128xi32>
      %33 = vector.broadcast %17 : i32 to vector<16x128xi32>
      %34 = arith.addi %33, %32 : vector<16x128xi32>
      %35 = arith.addi %34, %30 : vector<16x128xi32>
      %c2048_i32_12 = arith.constant 2048 : i32
      %36 = vector.broadcast %c2048_i32_12 : i32 to vector<16x128xi32>
      %37 = arith.cmpi slt, %35, %36 : vector<16x128xi32>
      %cst_13 = arith.constant 0.000000e+00 : f32
      %38 = vector.broadcast %cst_13 : f32 to vector<16x128xf32>
      %39 = arith.select %37, %14, %38 : vector<16x128xi1>, vector<16x128xf32>
      %c0_14 = arith.constant 0 : index
      %c0_15 = arith.constant 0 : index
      %40 = vector.load %arg4[%c0_14, %c0_15] : memref<8x128xf32, #tpu.memory_space<vmem>>, vector<8x128xf32>
      %41 = vector.shape_cast %39 : vector<16x128xf32> to vector<2x8x128xf32>
      %cst_16 = arith.constant dense<0.000000e+00> : vector<8x128xf32>
      %42 = vector.multi_reduction <add>, %41, %cst_16 [0] : vector<2x8x128xf32> to vector<8x128xf32>
      %43 = arith.addf %40, %42 : vector<8x128xf32>
      %c0_17 = arith.constant 0 : index
      %c0_18 = arith.constant 0 : index
      %44 = vector.load %arg4[%c0_17, %c0_18] : memref<8x128xf32, #tpu.memory_space<vmem>>, vector<8x128xf32>
      tpu.vector_store %arg4[%c0_17, %c0_18], %43 {strides = array<i32>} : memref<8x128xf32, #tpu.memory_space<vmem>>, vector<8x128xf32>,
    } else {
    }
    %c0_i32_10 = arith.constant 0 : i32
    %26 = arith.cmpi eq, %arg1, %c0_i32_10 : i32
    %27 = arith.extui %26 : i1 to i32
    %c0_i32_11 = arith.constant 0 : i32
    %28 = arith.cmpi ne, %27, %c0_i32_11 : i32
    scf.if %28 {
      %c0_12 = arith.constant 0 : index
      %c0_13 = arith.constant 0 : index
      %29 = vector.load %arg4[%c0_12, %c0_13] : memref<8x128xf32, #tpu.memory_space<vmem>>, vector<8x128xf32>
      %30 = vector.shape_cast %29 : vector<8x128xf32> to vector<1x8x128xf32>
      %cst_14 = arith.constant dense<0.000000e+00> : vector<1xf32>
      %31 = vector.multi_reduction <add>, %30, %cst_14 [1, 2] : vector<1x8x128xf32> to vector<1xf32>
      %32 = vector.shape_cast %31 : vector<1xf32> to vector<1x1x1xf32>
      %33 = vector.extract %32[0, 0, 0] : f32 from vector<1x1x1xf32>
      %34 = tpu.iota {dimensions = array<i32: 1>} : vector<1x128xi32>
      %c0_i32_15 = arith.constant 0 : i32
      %35 = vector.broadcast %c0_i32_15 : i32 to vector<1x128xi32>
      %36 = arith.cmpi eq, %34, %35 : vector<1x128xi32>
      %cst_16 = arith.constant 0.000000e+00 : f32
      %37 = vector.broadcast %33 : f32 to vector<1x128xf32>
      %38 = vector.broadcast %cst_16 : f32 to vector<1x128xf32>
      %39 = arith.select %36, %37, %38 : vector<1x128xi1>, vector<1x128xf32>
      %c0_17 = arith.constant 0 : index
      %c0_18 = arith.constant 0 : index
      %40 = vector.load %arg3[%c0_17, %c0_18] : memref<1x128xf32, #tpu.memory_space<vmem>>, vector<1x128xf32>
      tpu.vector_store %arg3[%c0_17, %c0_18], %39 {strides = array<i32>} : memref<1x128xf32, #tpu.memory_space<vmem>>, vector<1x128xf32>,
    } else {
    }
    return
  }
  func.func @transform_0(%arg0: i32, %arg1: i32) -> (i32, i32) {
    %c1_i32 = arith.constant 1 : i32
    %0 = arith.muli %arg0, %c1_i32 : i32
    %1 = arith.addi %0, %arg1 : i32
    %c0_i32 = arith.constant 0 : i32
    %2 = arith.minsi %1, %c0_i32 : i32
    %c0_i32_0 = arith.constant 0 : i32
    %c0_i32_1 = arith.constant 0 : i32
    return %2, %c0_i32_0 : i32, i32
  }
  func.func @transform_1(%arg0: i32, %arg1: i32) -> (i32, i32) {
    %c0_i32 = arith.constant 0 : i32
    %c0_i32_0 = arith.constant 0 : i32
    return %c0_i32, %arg0 : i32, i32
  }
}

</mosaic_0001>

<bundles_post_ra>
// kernel: tpu_custom_call.1
= control target key start
LH: loop header
LB: loop body
LE: loop exit
PB: predicated region body
PF: predicated region fallthrough
CT: control target
= control target key end

     0   :  { %6 = vsyncpa [#allocation4], 0  ;;  %s233_s0 = inlined_call_operand.hbm [shape: f32[16,128], index: 0, kind: input, shape index: {}]   ;;  %s234_s1 = inlined_call_operand.hbm [shape: f32[1,128], index: 1, kind: output, shape index: {}]  }
   0x1   :  { %7 = vsyncpa [#allocation5], 0  ;;  %s18_s8 = sshll.u32 %s233_s0, 4  ;;  %s213_s9 = smov [#allocation3]   ;;  %s19_s8 = int_to_ptr.hbm [resolvable:$true] %s18_s8 }
   0x2   :  { %s20_s10 = sshll.u32 %s213_s9, 4  ;;  %s214_s11 = smov 128   ;;  %s21_s10 = int_to_ptr.vmem [resolvable:$true] %s20_s10 }
   0x3   :  { %s215_s12 = smov 8  }
   0x4   :  { %26 = dma.hbm_to_vmem [thread:$0]  %s19_s8, 256, %s21_s10, [#allocation4], %s214_s11, %s214_s11, %s215_s12  }
   0x5   :  { %209 = dma.done.wait [#allocation4], 256  }
   0x6   :  { %210 = vsyncadd [#allocation4], 4294967040  ;;  %v40_v0 = vld [vmem:[#allocation3] sm:$0xff]  ;;  %v41_v1 = vld [vmem:[#allocation3 + $0x8] sm:$0xff]  ;;  %v122_v40 = vlaneseq  ;;  %s216_s0 = smov [#allocation6]   ;;  %s135_s16 = sshll.u32 %s234_s1, 4  ;;  %s136_s16 = int_to_ptr.hbm [resolvable:$true] %s135_s16 }
   0x7   :  { %v42_v2 = vand.u32 2147483647, %v40_v0  ;;  %v43_v3 = vand.u32 2147483647, %v41_v1  ;;  %v50_v15 = vmax.f32 %v40_v0, 0.0  ;;  %v51_v18 = vmax.f32 %v41_v1, 0.0 }
   0x8   :  { %v123_v41 = vand.u32 127, %v122_v40  ;;  %s133_s13 = sshll.u32 %s216_s0, 4  ;;  %s134_s13 = int_to_ptr.vmem [resolvable:$true] %s133_s13 }
   0x9   :  { %v44_v4 = vsub.f32 0.0, %v42_v2  ;;  %v45_v5 = vsub.f32 0.0, %v43_v3  ;;  %v52_v22 = vsub.f32 %v50_v15, %v40_v0  ;;  %v53_v25 = vsub.f32 %v51_v18, %v41_v1 }
   0xa   :  { %vm124_vm2 = vcmp.eq.s32.totalorder %v123_v41, 0 }
   0xb   :  { %v46_v6 = vmul.f32 1.442695, %v44_v4  ;;  %v48_v7 = vmul.f32 1.442695, %v45_v5 }
   0xd   :  { %153 = vpow2.f32 %v46_v6 }
   0xe   :  { %155 = vpow2.f32 %v48_v7 }
  0x13   :  { %v154_v8 = vpop.eup %153 }
  0x14   :  { %v156_v9 = vpop.eup %155  ;;  %v54_v10 = vadd.f32 1.0, %v154_v8  ;;  %v57_v11 = vmul.f32 -0.5, %v154_v8  ;;  %v60_v16 = vand.u32 2147483647, %v154_v8 }
  0x15   :  { %v63_v12 = vadd.f32 1.0, %v156_v9  ;;  %v66_v13 = vmul.f32 -0.5, %v156_v9  ;;  %v69_v19 = vand.u32 2147483647, %v156_v9 }
  0x16   :  { %157 = vlog2.f32 %v54_v10  ;;  %v58_v14 = vadd.f32 1.0, %v57_v11  ;;  %vm61_vm0 = vcmp.lt.f32.partialorder %v60_v16, 0.0004427343 }
  0x17   :  { %159 = vlog2.f32 %v63_v12  ;;  %v67_v17 = vadd.f32 1.0, %v66_v13  ;;  %vm70_vm1 = vcmp.lt.f32.partialorder %v69_v19, 0.0004427343 }
  0x18   :  { %v59_v20 = vmul.f32 %v154_v8, %v58_v14 }
  0x19   :  { %v68_v23 = vmul.f32 %v156_v9, %v67_v17 }
  0x1c   :  { %v158_v21 = vpop.eup %157 }
  0x1d   :  { %v160_v24 = vpop.eup %159  ;;  %v56_v26 = vmul.f32 0.6931472, %v158_v21 }
  0x1e   :  { %v65_v27 = vmul.f32 0.6931472, %v160_v24 }
  0x1f   :  { %v62_v28 = vsel %vm61_vm0, %v59_v20, %v56_v26 }
  0x20   :  { %v71_v29 = vsel %vm70_vm1, %v68_v23, %v65_v27  ;;  %v72_v30 = vadd.f32 %v62_v28, %v52_v22 }
  0x21   :  { %v73_v31 = vadd.f32 %v71_v29, %v53_v25 }
  0x23   :  { %v82_v32 = vadd.f32 %v73_v31, %v72_v30 }
  0x25   :  { %113 = vadd.xlane.f32.xlu0 %v82_v32 }
  0x98   :  { %v114_v33 = vpop.xlane.xlu0 %113 }
  0x99   :  { %v115_v34 = vrot.slane %v114_v33, 4 }
  0x9b   :  { %v116_v35 = vadd.f32 %v115_v34, %v114_v33 }
  0x9d   :  { %v117_v36 = vrot.slane %v116_v35, 2 }
  0x9f   :  { %v118_v37 = vadd.f32 %v117_v36, %v116_v35 }
  0xa1   :  { %v119_v38 = vrot.slane %v118_v37, 1 }
  0xa3   :  { %v120_v39 = vadd.f32 %v119_v38, %v118_v37 }
  0xa5   :  { %147 = vpush %v120_v39 }
  0xd6   :  { %s148_s17 = spop %147 }
  0xd7   :  { %v125_v42 = vstv %s148_s17 }
  0xd8   :  { %v126_v43 = vsel %vm124_vm2, %v125_v42, 0.0 }
  0xd9   :  { %127 = vst [vmem:[#allocation6] sm:$0x1] %v126_v43 }
  0xda   :  { %138 = dma.vmem_to_hbm [thread:$0]  %s134_s13, 16, %s136_s16, [#allocation5]  }
  0xdb   :  { %211 = dma.done.wait [#allocation5], 16  }
  0xdc   :  { %212 = vsyncadd [#allocation5], 4294967280 }
  0xdd   :  { %143 = vsyncpa [#allocation4], 1 }
  0xde   :  { %144 = vsyncpa [#allocation5], 1 }

</bundles_post_ra>
